<compile_context>
chip_gen: v6e
topology: v6e:2x2x1
jax: 0.10.0
libtpu: 0.0.40
codegen_flags: <defaults>
</compile_context>

<pallas_src>
import jax
import jax.numpy as jnp
from jax import lax
from jax.experimental import pallas as pl
from jax.experimental.pallas import tpu as pltpu


def _round_up(x, m):
    return (x + m - 1) // m * m


# --------------------------- Pallas kernels ---------------------------------
def _conv_stats_kernel(p_ref, w_ref, conv_ref, stats_ref):
    # p_ref:    [TILE_M, Kpad]  bf16 im2col patches tile
    # w_ref:    [Kpad, Cpad]    bf16 conv weight (resident across the grid)
    # conv_ref: [TILE_M, Cpad]  f32 raw conv output tile
    # stats_ref:[2, Cpad]       f32 per-tile (sum, sum of squares)
    acc = jnp.dot(p_ref[...], w_ref[...], preferred_element_type=jnp.float32)
    conv_ref[...] = acc
    stats_ref[0:1, :] = jnp.sum(acc, axis=0, keepdims=True)
    stats_ref[1:2, :] = jnp.sum(acc * acc, axis=0, keepdims=True)


def _bn_swish_kernel(ss_ref, x_ref, o_ref):
    # ss_ref: [2, Cpad] packed (scale, shift); x_ref/o_ref: [TILE_M, Cpad]
    x = x_ref[...]
    y = x * ss_ref[0:1, :] + ss_ref[1:2, :]        # folded BN: one FMA
    o_ref[...] = (y * jax.nn.sigmoid(y)).astype(o_ref.dtype)


# ----------------------------- Kernel wrapper --------------------------------
def _conv_bn_swish(patches, w_mat, gamma, beta, *, tile_m=512, eps=1e-5):
    """patches: [M, K] (any float dtype), w_mat: [K, Cout]. Returns [M, Cout] f32."""
    m, k = patches.shape
    cout = w_mat.shape[1]

    # Lane/sublane-friendly padding. Cout padded to a multiple of 128 so output
    # stores are unmasked; small K lane-padded to 128, large K to a sublane multiple.
    cpad = _round_up(cout, 128)
    kpad = 128 if k <= 128 else _round_up(k, 8)
    # TILE_M: as large as VMEM comfortably allows; default 512 stays well inside
    # the 32 MiB scoped default even on v7x's 64 MiB VMEM (bf16 patches tile +
    # f32 conv tile, double-buffered).
    tile_m = min(_round_up(tile_m, 8), _round_up(m, 8))
    m_pad = _round_up(m, tile_m)
    num_tiles = m_pad // tile_m

    # bf16 MXU operands (f32 accumulator inside the kernel).
    p = jnp.pad(patches, ((0, m_pad - m), (0, kpad - k))).astype(jnp.bfloat16)
    w = jnp.pad(w_mat, ((0, kpad - k), (0, cpad - cout))).astype(jnp.bfloat16)

    # ---- Pass 1: conv + per-tile partial batch statistics ----
    conv_out, partial = pl.pallas_call(
        _conv_stats_kernel,
        out_shape=(
            jax.ShapeDtypeStruct((m_pad, cpad), jnp.float32),
            jax.ShapeDtypeStruct((num_tiles, 2, cpad), jnp.float32),
        ),
        grid=(num_tiles,),
        in_specs=[
            pl.BlockSpec((tile_m, kpad), lambda i: (i, 0)),
            pl.BlockSpec((kpad, cpad), lambda i: (0, 0)),     # weights resident
        ],
        out_specs=(
            pl.BlockSpec((tile_m, cpad), lambda i: (i, 0)),
            pl.BlockSpec((None, 2, cpad), lambda i: (i, 0, 0)),
        ),
        compiler_params=pltpu.CompilerParams(
            dimension_semantics=("parallel",)),
    )(p, w)

    # ---- Tiny JAX reduction + BN fold (O(num_tiles * Cout), negligible) ----
    # Padded rows/channels are all-zero so they contribute nothing; divide by the
    # true M. Stats accumulated in f32; var clamped to guard E[x^2]-E[x]^2.
    sums = jnp.sum(partial[:, 0, :], axis=0)
    sqs = jnp.sum(partial[:, 1, :], axis=0)
    mean = sums / m
    var = jnp.maximum(sqs / m - mean * mean, 0.0)
    g = jnp.pad(gamma.astype(jnp.float32), (0, cpad - cout))
    b = jnp.pad(beta.astype(jnp.float32), (0, cpad - cout))
    scale = g * lax.rsqrt(var + eps)
    shift = b - mean * scale
    scale_shift = jnp.stack([scale, shift], axis=0)            # [2, Cpad]

    # ---- Pass 2: normalize + Swish (elementwise, fully parallel over M) ----
    out = pl.pallas_call(
        _bn_swish_kernel,
        out_shape=jax.ShapeDtypeStruct((m_pad, cpad), jnp.float32),
        grid=(num_tiles,),
        in_specs=[
            pl.BlockSpec((2, cpad), lambda i: (0, 0)),          # scale/shift resident
            pl.BlockSpec((tile_m, cpad), lambda i: (i, 0)),
        ],
        out_specs=pl.BlockSpec((tile_m, cpad), lambda i: (i, 0)),
        compiler_params=pltpu.CompilerParams(
            dimension_semantics=("parallel",)),
    )(scale_shift, conv_out)

    return out[:m, :cout]


# --------------------------------- Glue --------------------------------------
def _im2col_k3_s2_p1(x_nhwc):
    """im2col for kernel=3, stride=2, padding=1. Returns [N*Ho*Wo, 9*C]."""
    n, h, w, c = x_nhwc.shape
    ho = (h + 2 - 3) // 2 + 1
    wo = (w + 2 - 3) // 2 + 1
    xp = jnp.pad(x_nhwc, ((0, 0), (1, 1), (1, 1), (0, 0)))
    taps = []
    for kh in range(3):
        for kw in range(3):
            taps.append(
                lax.slice(
                    xp,
                    (0, kh, kw, 0),
                    (n, kh + 2 * (ho - 1) + 1, kw + 2 * (wo - 1) + 1, c),
                    (1, 2, 2, 1),
                )
            )
    patches = jnp.stack(taps, axis=3)            # [N, Ho, Wo, 9, C], (kh,kw) order
    return patches.reshape(n * ho * wo, 9 * c), (n, ho, wo)


def encoder_block_forward(x_nchw, conv_w, conv_b, bn_gamma, bn_beta, *, tile_m=512):
    """EncoderBlock forward. x: [N, Cin, H, W] -> [N, Cout, H/2, W/2]."""
    del conv_b  # cancelled exactly by training-mode BN mean subtraction
    n, cin, h, w = x_nchw.shape
    cout = conv_w.shape[0]
    # bf16 activations: halves HBM bytes of the im2col matrix (dominant read).
    x_nhwc = jnp.transpose(x_nchw, (0, 2, 3, 1)).astype(jnp.bfloat16)
    patches, (_, ho, wo) = _im2col_k3_s2_p1(x_nhwc)
    # OIHW -> (kh, kw, ci) x co, matching the patch layout above.
    w_mat = jnp.transpose(conv_w, (2, 3, 1, 0)).reshape(9 * cin, cout)
    out = _conv_bn_swish(patches, w_mat, bn_gamma, bn_beta, tile_m=tile_m)
    out = out.reshape(n, ho, wo, cout)
    return jnp.transpose(out, (0, 3, 1, 2))      # back to NCHW


# ---------------------------- Pure-JAX reference ----------------------------
def _reference(x, conv_w, conv_b, gamma, beta):
    # Conv inputs rounded to bf16 to match the kernel's MXU feed; all other
    # arithmetic (BN stats, normalization, Swish) in f32 like the kernel.
    xr = x.astype(jnp.bfloat16).astype(jnp.float32)
    wr = conv_w.astype(jnp.bfloat16).astype(jnp.float32)
    y = lax.conv_general_dilated(
        xr, wr, window_strides=(2, 2), padding=((1, 1), (1, 1)),
        dimension_numbers=("NCHW", "OIHW", "NCHW"))
    y = y + conv_b.reshape(1, -1, 1, 1)
    mean = jnp.mean(y, axis=(0, 2, 3), keepdims=True)
    var = jnp.mean(jnp.square(y - mean), axis=(0, 2, 3), keepdims=True)
    y = (y - mean) * lax.rsqrt(var + 1e-5)
    y = y * gamma.reshape(1, -1, 1, 1) + beta.reshape(1, -1, 1, 1)
    return y * jax.nn.sigmoid(y)


# ---------------------------------- Main -------------------------------------
if __name__ == "__main__":
    channels = (4, 8)                # EncoderBlock(channels)
    n, cin, h, w = 2, channels[0], 16, 16
    cout = channels[1]

    key = jax.random.PRNGKey(0)
    kx, kw_, kb = jax.random.split(key, 3)

    x = jax.random.normal(kx, (n, cin, h, w), dtype=jnp.float32)

    # Deterministic parameter init (PyTorch-like shapes / default BN affine).
    fan_in = cin * 3 * 3
    bound = 1.0 / jnp.sqrt(fan_in)
    conv_w = jax.random.uniform(kw_, (cout, cin, 3, 3), jnp.float32, -bound, bound)
    conv_b = jax.random.uniform(kb, (cout,), jnp.float32, -bound, bound)
    bn_gamma = jnp.ones((cout,), jnp.float32)
    bn_beta = jnp.zeros((cout,), jnp.float32)

    # Small tile_m so the test exercises the multi-tile path (grid=(2,)) and
    # the cross-tile batch-stat reduction; production default is 512.
    out = encoder_block_forward(x, conv_w, conv_b, bn_gamma, bn_beta, tile_m=64)
    out = jax.block_until_ready(out)

    ref = jax.block_until_ready(_reference(x, conv_w, conv_b, bn_gamma, bn_beta))
    assert out.shape == (n, cout, h // 2, w // 2), out.shape
    assert jnp.allclose(out, ref, atol=2e-3, rtol=2e-3), float(
        jnp.max(jnp.abs(out - ref)))

    print("KERNEL_OK")
</pallas_src>

<mosaic_0001>
module attributes {stable_mosaic.version = 11 : i64} {
  func.func @_conv_stats_kernel(%arg0: i32, %arg1: memref<64x128xbf16, #tpu.memory_space<vmem>>, %arg2: memref<128x128xbf16, #tpu.memory_space<vmem>>, %arg3: memref<64x128xf32, #tpu.memory_space<vmem>>, %arg4: memref<1x2x128xf32, #tpu.memory_space<vmem>>) attributes {dimension_semantics = [#tpu.dimension_semantics<parallel>], iteration_bounds = array<i64: 2>, scalar_prefetch = 0 : i64, scratch_operands = 0 : i64, tpu.core_type = #tpu.core_type<tc>, window_params = [{transform_indices = @transform_0, window_bounds = array<i64: 64, 128>}, {pipeline_mode = #tpu.pipeline_mode<synchronous>, transform_indices = @transform_1, window_bounds = array<i64: 128, 128>}, {transform_indices = @transform_2, window_bounds = array<i64: 64, 128>}, {transform_indices = @transform_3, window_bounds = array<i64: 1, 2, 128>}]} {
    %c0 = arith.constant 0 : index
    %c0_0 = arith.constant 0 : index
    %0 = vector.load %arg1[%c0, %c0_0] : memref<64x128xbf16, #tpu.memory_space<vmem>>, vector<64x128xbf16>
    %c0_1 = arith.constant 0 : index
    %c0_2 = arith.constant 0 : index
    %1 = vector.load %arg2[%c0_1, %c0_2] : memref<128x128xbf16, #tpu.memory_space<vmem>>, vector<128x128xbf16>
    %cst = arith.constant dense<0.000000e+00> : vector<64x128xf32>
    %2 = tpu.matmul %0, %1, %cst {dimension_numbers = #tpu.dot_dimension_numbers<[1], [0], [0], [1], [0, 0, 1, 1], [], []>} : vector<64x128xbf16>, vector<128x128xbf16>, vector<64x128xf32> -> vector<64x128xf32>
    %c0_3 = arith.constant 0 : index
    %c0_4 = arith.constant 0 : index
    %3 = vector.load %arg3[%c0_3, %c0_4] : memref<64x128xf32, #tpu.memory_space<vmem>>, vector<64x128xf32>
    tpu.vector_store %arg3[%c0_3, %c0_4], %2 {strides = array<i32>} : memref<64x128xf32, #tpu.memory_space<vmem>>, vector<64x128xf32>,
    %cst_5 = arith.constant dense<0.000000e+00> : vector<128xf32>
    %4 = vector.multi_reduction <add>, %2, %cst_5 [0] : vector<64x128xf32> to vector<128xf32>
    %5 = vector.shape_cast %4 : vector<128xf32> to vector<1x128xf32>
    %c0_6 = arith.constant 0 : index
    %c0_7 = arith.constant 0 : index
    %c0_8 = arith.constant 0 : index
    %6 = vector.load %arg4[%c0_6, %c0_7, %c0_8] : memref<1x2x128xf32, #tpu.memory_space<vmem>>, vector<1x1x128xf32>
    %7 = vector.shape_cast %6 : vector<1x1x128xf32> to vector<1x128xf32>
    %8 = vector.shape_cast %5 : vector<1x128xf32> to vector<1x1x128xf32>
    tpu.vector_store %arg4[%c0_6, %c0_7, %c0_8], %8 {strides = array<i32>} : memref<1x2x128xf32, #tpu.memory_space<vmem>>, vector<1x1x128xf32>,
    %9 = arith.mulf %2, %2 : vector<64x128xf32>
    %cst_9 = arith.constant dense<0.000000e+00> : vector<128xf32>
    %10 = vector.multi_reduction <add>, %9, %cst_9 [0] : vector<64x128xf32> to vector<128xf32>
    %11 = vector.shape_cast %10 : vector<128xf32> to vector<1x128xf32>
    %c0_10 = arith.constant 0 : index
    %c1 = arith.constant 1 : index
    %c0_11 = arith.constant 0 : index
    %12 = vector.load %arg4[%c0_10, %c1, %c0_11] : memref<1x2x128xf32, #tpu.memory_space<vmem>>, vector<1x1x128xf32>
    %13 = vector.shape_cast %12 : vector<1x1x128xf32> to vector<1x128xf32>
    %14 = vector.shape_cast %11 : vector<1x128xf32> to vector<1x1x128xf32>
    tpu.vector_store %arg4[%c0_10, %c1, %c0_11], %14 {strides = array<i32>} : memref<1x2x128xf32, #tpu.memory_space<vmem>>, vector<1x1x128xf32>,
    return
  }
  func.func @transform_0(%arg0: i32) -> (i32, i32) {
    %c0_i32 = arith.constant 0 : i32
    %c0_i32_0 = arith.constant 0 : i32
    return %arg0, %c0_i32 : i32, i32
  }
  func.func @transform_1(%arg0: i32) -> (i32, i32) {
    %c0_i32 = arith.constant 0 : i32
    %c0_i32_0 = arith.constant 0 : i32
    %c0_i32_1 = arith.constant 0 : i32
    return %c0_i32, %c0_i32_0 : i32, i32
  }
  func.func @transform_2(%arg0: i32) -> (i32, i32) {
    %c0_i32 = arith.constant 0 : i32
    %c0_i32_0 = arith.constant 0 : i32
    return %arg0, %c0_i32 : i32, i32
  }
  func.func @transform_3(%arg0: i32) -> (i32, i32, i32) {
    %c0_i32 = arith.constant 0 : i32
    %c0_i32_0 = arith.constant 0 : i32
    %c0_i32_1 = arith.constant 0 : i32
    return %arg0, %c0_i32, %c0_i32_0 : i32, i32, i32
  }
}

</mosaic_0001>

<bundles_post_ra>
// kernel: tpu_custom_call.1
= control target key start
LH: loop header
LB: loop body
LE: loop exit
PB: predicated region body
PF: predicated region fallthrough
CT: control target
= control target key end

     0   :  { %9 = vsyncpa [#allocation3], 0  ;;  %s1123_s0 = inlined_call_operand.hbm [shape: bf16[128,128], index: 0, kind: input, shape index: {}]   ;;  %s1124_s1 = inlined_call_operand.hbm [shape: bf16[128,128], index: 1, kind: input, shape index: {}]   ;;  %s1125_s2 = inlined_call_operand.hbm [shape: f32[128,128], index: 2, kind: output, shape index: {0}]   ;;  %s1126_s3 = inlined_call_operand.hbm [shape: f32[2,2,128], index: 3, kind: output, shape index: {1}]  }
   0x1   :  { %11 = vsyncpa [#allocation3 + $0x1], 0 }
   0x2   :  { %12 = vsyncpa [#allocation6], 0 }
   0x3   :  { %13 = vsyncpa [#allocation4], 0 }
   0x4   :  { %15 = vsyncpa [#allocation4 + $0x1], 0 }
   0x5   :  { %16 = vsyncpa [#allocation9], 0 }
   0x6   :  { %18 = vsyncpa [#allocation9 + $0x1], 0  ;;  %s915_s12 = smov 0   ;;  %s917_s13 = smov 0  }
   0x7   :  { %s919_s14 = smov 0   ;;  %s921_s15 = smov 0  }
   0x8 LB: > { %s936_s16 = sadd.s32 4294967295, %s885_s15   ;;  %s570_s17 = sadd.s32 4294967294, %s885_s15   ;;  %s885_s15 = sphi %s921_s15, %s1148_s15   ;;  %s881_s14 = sphi %s919_s14, %s1147_s14   ;;  %s877_s13 = sphi %s917_s13, %s1146_s13   ;;  %s873_s12 = sphi %s915_s12, %s1145_s12  }
   0x9   : > { %p44_p0 = scmp.ne.s32.totalorder %s877_s13, %s873_s12  ;;  %p1127_p1 = scmp.eq.s32.totalorder %s936_s16, 0 }
   0xa   : > { %p95_p3 = scmp.eq.s32.totalorder %s570_s17, 1  ;;  %p571_p5 = scmp.ge.s32.totalorder %s885_s15, 1 }
   0xb   : > { %p945_p4 = por %p1127_p1, %p44_p0  ;;  %p128_p7 = scmp.lt.s32.totalorder %s885_s15, 3 }
   0xc   : > { %p950_p6 = por %p95_p3, %p44_p0  ;;  %s887_s21 = smov [#allocation5]  }
   0xd   : > { %s1131_s18 = scalar_select %p945_p4, 1, 0 }
   0xe   : > { %s1132_s19 = scalar_select %p950_p6, 1, 0 }
   0xf   : > { %p955_p8 = pnand %p571_p5, %p128_p7  ;;  %s140_s22 = sshll.u32 %s887_s21, 4  ;;  %s141_s22 = int_to_ptr.vmem [resolvable:$true] %s140_s22 }
  0x10   : > { %s969_s24 = sadd.s32 1, %s885_s15   ;;  %s31_s25 = sadd.s32 1, %s881_s14 }
  0x11   : > { %s1133_s20 = scalar_select %p955_p8, 1, 0 }
  0x12   : > { %p665_p9 = pneg %p955_p8  ;;  %s28_s26 = ssub.s32 %s885_s15, %s969_s24 }
  0x13   : > { %s744_s27 = scalar_lea.vmem %s141_s22, 1024  ;;  %p752_p5 = scmp.lt.s32.totalorder %s141_s22, %s141_s22 }
  0x14   : > { %p964_p11 = pnand %p665_p9, %p1127_p1  ;;  %p745_p13 = scmp.ne.s32.totalorder %s141_s22, %s744_s27 }
  0x15   : > { %p753_p7 = scmp.lt.s32.totalorder %s744_s27, %s744_s27 }
  0x16   : > { %p735_p12 = pneg %p964_p11 }
  0x17   : > { %p754_p10 = por %p753_p7, %p752_p5 }
  0x18   : > { %p747_p0 = pnand %p745_p13, %p735_p12 }
  0x1a   : > { %p748_p3 = pneg %p747_p0 }
  0x1c   : > { %p755_p2 = pnand %p754_p10, %p748_p3 }
  0x1e   : > { %758 = shalt.err (!%p755_p2)
}
  0x1f   : > { %s888_s28 = smov 64   ;;  %s889_s29 = smov 4  }
  0x20   : > { %668 = dma.hbm_to_vmem [thread:$0]  (!%p964_p11), %s1124_s1, 1024, %s141_s22, [#allocation6], %s888_s28, %s888_s28, %s889_s29  }
  0x21   : > { %p29_p2 = scmp.eq.s32.totalorder %s28_s26, 0  ;;  %p38_p9 = scmp.ne.s32.totalorder %s881_s14, %s877_s13 }
  0x22   : > { %p39_p10 = scmp.eq.s32.totalorder %s885_s15, 0  ;;  %p681_p12 = scmp.lt.s32.totalorder %s885_s15, 2 }
  0x23   : > { %s989_s5 = scalar_select %p29_p2, %s881_s14, %s31_s25  }
  0x24   : > { %p40_p13 = por %p39_p10, %p38_p9  ;;  %p1135_p0 = scmp.eq.s32.totalorder %s936_s16, 1 }
  0x25   : > { %s154_s7 = sand.u32 1, %s881_s14   ;;  %s601_s8 = sshll.u32 %s885_s15, 9 }
  0x26   : > { %p993_p3 = por %p1135_p0, %p38_p9  ;;  %s574_s9 = sshll.u32 %s154_s7, 5 }
  0x27   : > { %s1002_s17 = scalar_lea.hbm %s1123_s0, %s601_s8  ;;  %s158_s21 = scalar_lea.vmem [#allocation2], %s574_s9 }
  0x28   : > { %s1136_s6 = scalar_select %p993_p3, 1, 0 }
  0x29   : > { %s165_s22 = sshll.u32 %s158_s21, 4  ;;  %p1004_p11 = pnand %p681_p12, %p40_p13  ;;  %s1008_s22 = int_to_ptr.vmem [resolvable:$true] %s165_s22 }
  0x2a   : > { %s1010_s25 = scalar_lea.sflag [#allocation3], %s154_s7  ;;  %s759_s26 = scalar_lea.hbm %s1002_s17, 512 }
  0x2b   : > { %p760_p5 = scmp.ne.s32.totalorder %s1002_s17, %s759_s26  ;;  %p761_p7 = pneg %p1004_p11 }
  0x2c   : > { %s764_s4 = scalar_lea.hbm %s1123_s0, 1024  ;;  %p765_p10 = scmp.lt.s32.totalorder %s1002_s17, %s1123_s0 }
  0x2d   : > { %p762_p2 = pnand %p761_p7, %p760_p5  ;;  %p766_p12 = scmp.lt.s32.totalorder %s764_s4, %s759_s26 }
  0x2f   : > { %p763_p9 = pneg %p762_p2  ;;  %p767_p13 = por %p766_p12, %p765_p10 }
  0x31   : > { %p768_p0 = pnand %p767_p13, %p763_p9 }
  0x33   : > { %771 = shalt.err (!%p768_p0)
}
  0x34   : > { %s772_s7 = scalar_lea.vmem %s1008_s22, 512  ;;  %s890_s10 = smov [#allocation2]  }
  0x35   : > { %p773_p1 = scmp.ne.s32.totalorder %s1008_s22, %s772_s7  ;;  %s777_s11 = sshll.u32 %s890_s10, 4  ;;  %s778_s11 = int_to_ptr.vmem [resolvable:$false] %s777_s11 }
  0x36   : > { %s779_s21 = scalar_lea.vmem %s778_s11, 1024  ;;  %p780_p2 = scmp.lt.s32.totalorder %s1008_s22, %s778_s11 }
  0x37   : > { %p775_p6 = pnand %p773_p1, %p761_p7  ;;  %p781_p3 = scmp.lt.s32.totalorder %s779_s21, %s772_s7 }
  0x39   : > { %p776_p5 = pneg %p775_p6  ;;  %p782_p4 = por %p781_p3, %p780_p2 }
  0x3b   : > { %p783_p8 = pnand %p782_p4, %p776_p5 }
  0x3d   : > { %786 = shalt.err (!%p783_p8)
}
  0x3e   : > { %672 = dma.hbm_to_vmem [thread:$0]  (!%p1004_p11), %s1002_s17, 512, %s1008_s22, %s1010_s25, %s888_s28, %s888_s28, %s889_s29  }
  0x3f   : > { %p1138_p1 = scmp.ne.s32.totalorder %s1133_s20, 0 }
  0x40   : > { %s1037_s26 = sand.u32 (!%p1138_p1), 1, %s877_s13   ;;  %p1139_p4 = scmp.ne.s32.totalorder (!%p1138_p1), %s1131_s18, 0 }
  0x41   : > { %177 = sbr.rel (%p1138_p1) target bundleno = 357 (0x165), region = 28  ;;  %s578_s27 = sshll.u32 (!%p1138_p1), %s1037_s26, 5 }
  0x42   : > { %s180_s30 = scalar_lea.sflag (!%p1138_p1), [#allocation3], %s1037_s26  ;;  %s1041_s4 = scalar_lea.vmem (!%p1138_p1), [#allocation2], %s578_s27 }
  0x46   : > { %856 = dma.done.wait (%p1139_p4), %s180_s30, 512  }
  0x47   : > { %858 = vsyncadd (%p1139_p4), %s180_s30, 4294966784  ;;  %p1140_p6 = scmp.eq.s32.totalorder %s936_s16, 0 }
  0x49   : > { %860 = dma.done.wait (%p1140_p6), [#allocation6], 1024   ;;  %p1141_p8 = pmov %p1140_p6 }
  0x4a   : > { %v721_v0 = vld [vmem:[#allocation5 + $0x38] sm:$0xff]   ;;  %v722_v1 = vld [vmem:[#allocation5 + $0x30] sm:$0xff]   ;;  %v723_v2 = vld [vmem:[#allocation5 + $0x28] sm:$0xff]   ;;  %s580_s18 = sshll.u32 %s1037_s26, 6  ;;  %s602_s29 = sshll.u32 %s936_s16, 10 }
  0x4b   : > { %862 = vsyncadd (%p1141_p8), [#allocation6], 4294966272  ;;  %615 = vmatprep.subr.bf16.mxu0 %v721_v0  ;;  %639 = vmatprep.subr.bf16.mxu1 %v721_v0  ;;  %v724_v3 = vld [vmem:[#allocation5 + $0x20] sm:$0xff]   ;;  %v731_v5 = vld [vmem:[%s1041_s4 + $0x10] sm:$0xff]   ;;  %s207_s20 = scalar_lea.vmem [#allocation7], %s580_s18  ;;  %s1062_s23 = scalar_lea.hbm %s1125_s2, %s602_s29 }
  0x4c   : > { %616 = vmatpush3.bf16.msra.mxu0 %v721_v0  ;;  %647 = vmatpush3.bf16.msra.mxu1 %v721_v0  ;;  %v729_v4 = vld [vmem:[%s1041_s4] sm:$0xff]   ;;  %v725_v6 = vld [vmem:[#allocation5 + $0x18] sm:$0xff]   ;;  %v726_v7 = vld [vmem:[#allocation5 + $0x10] sm:$0xff]   ;;  %s442_s28 = sshll.u32 %s207_s20, 4  ;;  %s424_s25 = scalar_lea.sflag [#allocation4], %s1037_s26  ;;  %s1057_s28 = int_to_ptr.vmem [resolvable:$true] %s442_s28 }
  0x4d   : > { %617 = vmatprep.subr.bf16.mxu0 %v722_v1  ;;  %640 = vmatprep.subr.bf16.mxu1 %v722_v1  ;;  %v727_v8 = vld [vmem:[#allocation5 + $0x8] sm:$0xff]   ;;  %v728_v9 = vld [vmem:[#allocation5] sm:$0xff]   ;;  %v732_v11 = vld [vmem:[%s1041_s4 + $0x18] sm:$0xff]   ;;  %s787_s8 = scalar_lea.vmem %s1057_s28, 1024  ;;  %p1142_p11 = scmp.ne.s32.totalorder %s1136_s6, 0 }
  0x4e   : > { %631 = vmatprep.mubr.bf16.mxu0 %v729_v4  ;;  %635 = vmatprep.mubr.bf16.mxu1 %v731_v5  ;;  %v730_v10 = vld [vmem:[%s1041_s4 + $0x8] sm:$0xff]   ;;  %p788_p3 = scmp.ne.s32.totalorder %s1057_s28, %s787_s8  ;;  %s891_s9 = smov [#allocation7]  }
  0x4f   : > { %s791_s7 = sshll.u32 %s891_s9, 4  ;;  %s792_s7 = int_to_ptr.vmem [resolvable:$false] %s791_s7 }
  0x50   : > { %618 = vmatpush3.bf16.msra.mxu0 %v722_v1  ;;  %648 = vmatpush3.bf16.msra.mxu1 %v722_v1  ;;  %p789_p7 = pnand %p788_p3, %p1142_p11  ;;  %s793_s10 = scalar_lea.vmem %s792_s7, 2048 }
  0x51   : > { %619 = vmatprep.subr.bf16.mxu0 %v723_v2  ;;  %641 = vmatprep.subr.bf16.mxu1 %v723_v2  ;;  %p794_p10 = scmp.lt.s32.totalorder %s1057_s28, %s792_s7  ;;  %p795_p12 = scmp.lt.s32.totalorder %s793_s10, %s787_s8 }
  0x52   : > { %p790_p9 = pneg %p789_p7 }
  0x53   : > { %p796_p13 = por %p795_p12, %p794_p10 }
  0x54   : > { %620 = vmatpush3.bf16.msra.mxu0 %v723_v2  ;;  %649 = vmatpush3.bf16.msra.mxu1 %v723_v2 }
  0x55   : > { %621 = vmatprep.subr.bf16.mxu0 %v724_v3  ;;  %642 = vmatprep.subr.bf16.mxu1 %v724_v3  ;;  %p797_p0 = pnand %p796_p13, %p790_p9 }
  0x58   : > { %622 = vmatpush3.bf16.msra.mxu0 %v724_v3  ;;  %650 = vmatpush3.bf16.msra.mxu1 %v724_v3 }
  0x59   : > { %623 = vmatprep.subr.bf16.mxu0 %v725_v6  ;;  %643 = vmatprep.subr.bf16.mxu1 %v725_v6 }
  0x5c   : > { %624 = vmatpush3.bf16.msra.mxu0 %v725_v6  ;;  %651 = vmatpush3.bf16.msra.mxu1 %v725_v6 }
  0x5d   : > { %625 = vmatprep.subr.bf16.mxu0 %v726_v7  ;;  %644 = vmatprep.subr.bf16.mxu1 %v726_v7 }
  0x60   : > { %626 = vmatpush3.bf16.msra.mxu0 %v726_v7  ;;  %652 = vmatpush3.bf16.msra.mxu1 %v726_v7 }
  0x61   : > { %627 = vmatprep.subr.bf16.mxu0 %v727_v8  ;;  %645 = vmatprep.subr.bf16.mxu1 %v727_v8 }
  0x64   : > { %628 = vmatpush3.bf16.msra.mxu0 %v727_v8  ;;  %653 = vmatpush3.bf16.msra.mxu1 %v727_v8 }
  0x65   : > { %629 = vmatprep.subr.bf16.mxu0 %v728_v9  ;;  %646 = vmatprep.subr.bf16.mxu1 %v728_v9 }
  0x68   : > { %630 = vmatpush3.bf16.msra.mxu0 %v728_v9  ;;  %654 = vmatpush3.bf16.msra.mxu1 %v728_v9 }
  0x6b   : > { %632 = vmatmul.mubr.bf16.vlgmr.msra.gmra.mxu0 %v730_v10  ;;  %636 = vmatmul.mubr.bf16.vlgmr.msra.gmra.mxu1 %v732_v11 }
 0x12b   : > { %v633_v12 = vpop.f32.mrf.mxu0  ;;  %v637_v13 = vpop.f32.mrf.mxu1 }
 0x12c   : > { %381 = vst [vmem:[%s207_s20 + $0x10] sm:$0xff] %v633_v12  ;;  %385 = vst [vmem:[%s207_s20 + $0x30] sm:$0xff] %v637_v13 }
 0x12d   : > { %v348_v14 = vpop.f32.mrf.mxu0  ;;  %v364_v15 = vpop.f32.mrf.mxu1 }
 0x12e   : > { %379 = vst [vmem:[%s207_s20] sm:$0xff] %v348_v14  ;;  %383 = vst [vmem:[%s207_s20 + $0x20] sm:$0xff] %v364_v15  ;;  %v401_v20 = vmul.f32 %v348_v14, %v348_v14 }
 0x12f   : > { %v634_v16 = vpop.f32.mrf.mxu0  ;;  %v638_v17 = vpop.f32.mrf.mxu1 }
 0x130   : > { %382 = vst [vmem:[%s207_s20 + $0x18] sm:$0xff] %v634_v16  ;;  %386 = vst [vmem:[%s207_s20 + $0x38] sm:$0xff] %v638_v17 }
 0x131   : > { %v351_v18 = vpop.f32.mrf.mxu0  ;;  %v367_v19 = vpop.f32.mrf.mxu1 }
 0x132   : > { %380 = vst [vmem:[%s207_s20 + $0x8] sm:$0xff] %v351_v18  ;;  %v387_v21 = vadd.f32 %v351_v18, %v348_v14  ;;  %v402_v22 = vmul.f32 %v351_v18, %v351_v18  ;;  %384 = vst [vmem:[%s207_s20 + $0x28] sm:$0xff] %v367_v19 }
 0x133   : > { %800 = shalt.err (!%p797_p0)
}
 0x134   : > { %s801_s11 = scalar_lea.hbm %s1062_s23, 1024  ;;  %s805_s30 = scalar_lea.hbm %s1125_s2, 2048 }
 0x135   : > { %p802_p5 = scmp.ne.s32.totalorder %s1062_s23, %s801_s11  ;;  %p806_p4 = scmp.lt.s32.totalorder %s1062_s23, %s1125_s2 }
 0x136   : > { %p807_p6 = scmp.lt.s32.totalorder %s805_s30, %s801_s11 }
 0x137   : > { %p803_p2 = pnand %p802_p5, %p1142_p11 }
 0x138   : > { %p808_p8 = por %p807_p6, %p806_p4 }
 0x139   : > { %p804_p1 = pneg %p803_p2 }
 0x13b   : > { %p809_p3 = pnand %p808_p8, %p804_p1 }
 0x13d   : > { %812 = shalt.err (!%p809_p3)
}
 0x13e   : > { %s892_s20 = smov 128   ;;  %s893_s29 = smov 8   ;;  %v403_v23 = vmul.f32 %v633_v12, %v633_v12  ;;  %v388_v24 = vadd.f32 %v633_v12, %v387_v21  ;;  %v409_v25 = vadd.f32 %v402_v22, %v401_v20  ;;  %v404_v26 = vmul.f32 %v634_v16, %v634_v16 }
 0x13f   : > { %661 = dma.vmem_to_hbm [thread:$0]  (%p1142_p11), %s1057_s28, 1024, %s1062_s23, %s424_s25, %s892_s20, %s892_s20, %s893_s29   ;;  %v405_v29 = vmul.f32 %v364_v15, %v364_v15  ;;  %v406_v33 = vmul.f32 %v367_v19, %v367_v19  ;;  %v407_v35 = vmul.f32 %v637_v13, %v637_v13  ;;  %v408_v38 = vmul.f32 %v638_v17, %v638_v17 }
 0x140   : > { %v410_v27 = vadd.f32 %v409_v25, %v403_v23  ;;  %v389_v28 = vadd.f32 %v634_v16, %v388_v24  ;;  %s581_s28 = sshll.u32 %s1037_s26, 1  ;;  %s598_s17 = sshll.u32 %s936_s16, 5 }
 0x141   : > { %s214_s22 = scalar_lea.vmem [#allocation8], %s581_s28  ;;  %s456_s9 = scalar_lea.hbm %s1126_s3, %s598_s17 }
 0x142   : > { %v390_v30 = vadd.f32 %v389_v28, %v364_v15  ;;  %v411_v31 = vadd.f32 %v410_v27, %v404_v26  ;;  %s458_s23 = sshll.u32 %s214_s22, 4  ;;  %s429_s7 = scalar_lea.sflag [#allocation9], %s1037_s26  ;;  %s459_s23 = int_to_ptr.vmem [resolvable:$true] %s458_s23 }
 0x143   : > { %s813_s10 = scalar_lea.vmem %s459_s23, 32  ;;  %s894_s11 = smov [#allocation8]  }
 0x144   : > { %v391_v32 = vadd.f32 %v390_v30, %v367_v19  ;;  %v412_v34 = vadd.f32 %v411_v31, %v405_v29  ;;  %p814_p7 = scmp.ne.s32.totalorder %s459_s23, %s813_s10  ;;  %s817_s16 = sshll.u32 %s894_s11, 4  ;;  %s818_s16 = int_to_ptr.vmem [resolvable:$false] %s817_s16 }
 0x145   : > { %s819_s21 = scalar_lea.vmem %s818_s16, 64  ;;  %p820_p12 = scmp.lt.s32.totalorder %s459_s23, %s818_s16 }
 0x146   : > { %v392_v36 = vadd.f32 %v637_v13, %v391_v32  ;;  %v413_v37 = vadd.f32 %v412_v34, %v406_v33  ;;  %p815_p9 = pnand %p814_p7, %p1142_p11  ;;  %p821_p13 = scmp.lt.s32.totalorder %s819_s21, %s813_s10 }
 0x148   : > { %v393_v39 = vadd.f32 %v638_v17, %v392_v36  ;;  %v414_v40 = vadd.f32 %v413_v37, %v407_v35  ;;  %p816_p10 = pneg %p815_p9  ;;  %p822_p0 = por %p821_p13, %p820_p12 }
 0x14a   : > { %v394_v41 = vrot.slane %v393_v39, 4  ;;  %v415_v42 = vadd.f32 %v414_v40, %v408_v38  ;;  %p823_p5 = pnand %p822_p0, %p816_p10 }
 0x14c   : > { %v395_v43 = vadd.f32 %v394_v41, %v393_v39  ;;  %v416_v44 = vrot.slane %v415_v42, 4 }
 0x14e   : > { %v396_v45 = vrot.slane %v395_v43, 2  ;;  %v417_v46 = vadd.f32 %v416_v44, %v415_v42 }
 0x150   : > { %v397_v47 = vadd.f32 %v396_v45, %v395_v43  ;;  %v418_v48 = vrot.slane %v417_v46, 2 }
 0x152   : > { %v398_v49 = vrot.slane %v397_v47, 1  ;;  %v419_v50 = vadd.f32 %v418_v48, %v417_v46 }
 0x154   : > { %v399_v51 = vadd.f32 %v398_v49, %v397_v47  ;;  %v420_v52 = vrot.slane %v419_v50, 1 }
 0x156   : > { %400 = vst [vmem:[%s214_s22] sm:$0x1] %v399_v51  ;;  %v421_v53 = vadd.f32 %v420_v52, %v419_v50 }
 0x158   : > { %422 = vst [vmem:[%s214_s22 + $0x1] sm:$0x1] %v421_v53 }
 0x159   : > { %826 = shalt.err (!%p823_p5)
}
 0x15a   : > { %s827_s27 = scalar_lea.hbm %s456_s9, 32  ;;  %s831_s4 = scalar_lea.hbm %s1126_s3, 64 }
 0x15b   : > { %p828_p2 = scmp.ne.s32.totalorder %s456_s9, %s827_s27  ;;  %p832_p6 = scmp.lt.s32.totalorder %s456_s9, %s1126_s3 }
 0x15c   : > { %p833_p8 = scmp.lt.s32.totalorder %s831_s4, %s827_s27 }
 0x15d   : > { %p829_p1 = pnand %p828_p2, %p1142_p11 }
 0x15e   : > { %p834_p3 = por %p833_p8, %p832_p6 }
 0x15f   : > { %p830_p4 = pneg %p829_p1 }
 0x161   : > { %p835_p7 = pnand %p834_p3, %p830_p4 }
 0x163   : > { %838 = shalt.err (!%p835_p7)
}
 0x164   : > { %662 = dma.vmem_to_hbm [thread:$0]  (%p1142_p11), %s459_s23, 32, %s456_s9, %s429_s7  }
 0x165 PF: > { %s470_s29 = sand.u32 1, %s873_s12   ;;  %p1143_p9 = scmp.ne.s32.totalorder %s1132_s19, 0 }
 0x166   : > { %p1144_p10 = scmp.ge.s32.totalorder %s885_s15, 2  ;;  %s471_s28 = scalar_lea.sflag [#allocation4], %s470_s29 }
 0x168   : > { %p674_p12 = pnand %p1144_p10, %p1143_p9 }
 0x16a   : > { %p675_p13 = pneg %p674_p12 }
 0x16c   : > { %864 = dma.done.wait (%p675_p13), %s471_s28, 1024  }
 0x16d   : > { %866 = vsyncadd (%p675_p13), %s471_s28, 4294966272  ;;  %s480_s17 = scalar_lea.sflag [#allocation9], %s470_s29 }
 0x16e   : > { %868 = dma.done.wait (%p675_p13), %s480_s17, 32  }
 0x16f   : > { %870 = vsyncadd (%p675_p13), %s480_s17, 4294967264  ;;  %p21_p11 = scmp.ge.s32.totalorder %s969_s24, 4   ;;  %s1145_s12 = smov %s877_s13 }
 0x170   : > { %s1146_s13 = smov %s881_s14  ;;  %s1147_s14 = smov %s989_s5 }
 0x171   : > { %s1148_s15 = smov %s969_s24  ;;  %23 = sbr.rel (!%p21_p11) target bundleno = 8 (0x8), region = 94 }
 0x176   :  { %485 = vsyncpa [#allocation3], 1 }
 0x177   :  { %487 = vsyncpa [#allocation3 + $0x1], 1 }
 0x178   :  { %488 = vsyncpa [#allocation6], 1 }
 0x179   :  { %489 = vsyncpa [#allocation4], 1 }
 0x17a   :  { %491 = vsyncpa [#allocation4 + $0x1], 1 }
 0x17b   :  { %492 = vsyncpa [#allocation9], 1 }
 0x17c   :  { %494 = vsyncpa [#allocation9 + $0x1], 1 }

</bundles_post_ra>
